<compile_context>
chip_gen: v6e
topology: v6e:2x2x1
jax: 0.10.0
libtpu: 0.0.40
codegen_flags: <defaults>
</compile_context>

<pallas_src>
import jax
import jax.numpy as jnp
from jax.experimental import pallas as pl
from jax.experimental.pallas import tpu as pltpu

HIDDEN = 64


def _padded_width(d_out: int) -> int:
    """Lane-dense width: at least 128 and a multiple of 128, covering HIDDEN."""
    return max(128, ((d_out + 127) // 128) * 128)


def net_kernel(feat_ref, slab_ref, out_ref):
    # feat_ref: (1, 1) f32 in SMEM (the learned scalar parameter).
    # slab_ref: (8 + 2*HIDDEN, W) f32 in VMEM, packed params:
    #   row 0: w1 (1,64)  zero-padded to W lanes
    #   row 1: b1         zero-padded
    #   row 2: b2         zero-padded
    #   row 3: b3 (1,D)   zero-padded
    #   row 4: scale  (1.0 for lanes < ntrigs, else 0.5)
    #   row 5: offset (0.0 for lanes < ntrigs, else 0.5)
    #   rows 8          .. 8+HIDDEN-1   : w2 (64,64) zero-padded to (64, W)
    #   rows 8+HIDDEN   .. 8+2*HIDDEN-1 : w3 (64,D)  zero-padded to (64, W)
    # out_ref: (1, W) lane-dense fused output.
    f = feat_ref[0, 0]                       # scalar (sreg)

    rows8 = slab_ref[0:8, :]                 # one full (8, W) load
    w1 = rows8[0:1, :]                       # (1, W) in-register row slices
    b1 = rows8[1:2, :]
    b2 = rows8[2:3, :]
    b3 = rows8[3:4, :]
    scale = rows8[4:5, :]
    offset = rows8[5:6, :]

    w2 = slab_ref[8:8 + HIDDEN, :]                       # (64, W)
    w3 = slab_ref[8 + HIDDEN:8 + 2 * HIDDEN, :]          # (64, W)

    # Layer 1: Linear(1, 64) + ReLU. Scalar * vector on the VPU.
    # Padded lanes: 0*f + 0 -> relu -> 0, so they stay exactly zero.
    h1 = jnp.maximum(f * w1 + b1, 0.0)                               # (1, W)

    # Layer 2: Linear(64, 64) + ReLU (MXU, f32 accumulate). Only the first
    # HIDDEN lanes of h1 are nonzero, so contracting over them is exact.
    h2 = jnp.dot(h1[:, :HIDDEN], w2, preferred_element_type=jnp.float32)
    h2 = jnp.maximum(h2 + b2, 0.0)                                   # (1, W)

    # Layer 3: Linear(64, ntrigs+ncols) + tanh.
    y = jnp.dot(h2[:, :HIDDEN], w3, preferred_element_type=jnp.float32)
    y = jnp.tanh(y + b3)                                             # (1, W)

    # Fused split-affine via precomputed scale/offset rows (single FMA).
    # Padded lanes become 0.5 but are sliced off by the wrapper.
    out_ref[...] = y * scale + offset


def pack_params(params, ntrigs: int, ncols: int):
    """Pack the 7 raw parameters into (feat_smem, slab) for the kernel."""
    feat, w1, b1, w2, b2, w3, b3 = params
    d_out = ntrigs + ncols
    width = _padded_width(d_out)

    slab = jnp.zeros((8 + 2 * HIDDEN, width), jnp.float32)
    slab = slab.at[0, :HIDDEN].set(w1[0])
    slab = slab.at[1, :HIDDEN].set(b1[0])
    slab = slab.at[2, :HIDDEN].set(b2[0])
    slab = slab.at[3, :d_out].set(b3[0])

    lane = jnp.arange(width)
    slab = slab.at[4, :].set(jnp.where(lane < ntrigs, 1.0, 0.5).astype(jnp.float32))
    slab = slab.at[5, :].set(jnp.where(lane < ntrigs, 0.0, 0.5).astype(jnp.float32))

    slab = slab.at[8:8 + HIDDEN, :HIDDEN].set(w2)
    slab = slab.at[8 + HIDDEN:8 + HIDDEN + HIDDEN, :d_out].set(w3)

    return feat.reshape(1, 1).astype(jnp.float32), slab


def net_forward(feat_smem, slab, ntrigs: int, ncols: int):
    """Run the Pallas kernel. Returns (trigs, cols) of shapes (ntrigs,), (ncols,)."""
    d_out = ntrigs + ncols
    width = slab.shape[1]

    out = pl.pallas_call(
        net_kernel,
        out_shape=jax.ShapeDtypeStruct((1, width), jnp.float32),
        in_specs=[
            pl.BlockSpec(memory_space=pltpu.MemorySpace.SMEM),   # feat scalar
            pl.BlockSpec(memory_space=pltpu.MemorySpace.VMEM),   # packed slab
        ],
        out_specs=pl.BlockSpec(memory_space=pltpu.MemorySpace.VMEM),
    )(feat_smem, slab)

    y = out[0]
    return y[:ntrigs], y[ntrigs:d_out]


def init_params(key, ntrigs: int, ncols: int):
    """Deterministic parameter init mirroring torch.nn.Linear default
    (uniform(-1/sqrt(fan_in), 1/sqrt(fan_in))). `features` starts at zeros,
    exactly as in the PyTorch module's __init__."""
    d_out = ntrigs + ncols
    k1, k2, k3, k4, k5, k6 = jax.random.split(key, 6)

    def unif(k, shape, fan_in):
        bound = 1.0 / jnp.sqrt(jnp.float32(fan_in))
        return jax.random.uniform(k, shape, jnp.float32, -bound, bound)

    feat = jnp.zeros((1, 1), jnp.float32)                 # torch: zeros((1,))
    w1 = unif(k1, (1, HIDDEN), 1)                         # (in, out) layout
    b1 = unif(k2, (1, HIDDEN), 1)
    w2 = unif(k3, (HIDDEN, HIDDEN), HIDDEN)
    b2 = unif(k4, (1, HIDDEN), HIDDEN)
    w3 = unif(k5, (HIDDEN, d_out), HIDDEN)
    b3 = unif(k6, (1, d_out), HIDDEN)
    return (feat, w1, b1, w2, b2, w3, b3)


def reference_forward(params, ntrigs: int, ncols: int):
    """Pure-JAX reference matching the PyTorch forward semantics."""
    feat, w1, b1, w2, b2, w3, b3 = params
    h1 = jnp.maximum(feat @ w1 + b1, 0.0)
    h2 = jnp.maximum(h1 @ w2 + b2, 0.0)
    y = jnp.tanh(h2 @ w3 + b3)[0]
    return y[:ntrigs], y[ntrigs:] * 0.5 + 0.5


if __name__ == "__main__":
    ntrigs, ncols = 8, 8
    key = jax.random.PRNGKey(0)
    params = init_params(key, ntrigs, ncols)

    feat_smem, slab = pack_params(params, ntrigs, ncols)
    trigs, cols = net_forward(feat_smem, slab, ntrigs, ncols)
    jax.block_until_ready((trigs, cols))

    ref_trigs, ref_cols = reference_forward(params, ntrigs, ncols)
    assert trigs.shape == (ntrigs,) and cols.shape == (ncols,)
    assert jnp.allclose(trigs, ref_trigs, atol=1e-5, rtol=1e-5)
    assert jnp.allclose(cols, ref_cols, atol=1e-5, rtol=1e-5)

    print("KERNEL_OK")
</pallas_src>

<mosaic_0001>
module attributes {stable_mosaic.version = 11 : i64} {
  func.func @net_kernel(%arg0: memref<1x1xf32, #tpu.memory_space<smem>>, %arg1: memref<136x128xf32, #tpu.memory_space<vmem>>, %arg2: memref<1x128xf32, #tpu.memory_space<vmem>>) attributes {dimension_semantics = [], scalar_prefetch = 0 : i64, scratch_operands = 0 : i64, tpu.core_type = #tpu.core_type<tc>} {
    %c0 = arith.constant 0 : index
    %c0_0 = arith.constant 0 : index
    %0 = memref.load %arg0[%c0, %c0_0] : memref<1x1xf32, #tpu.memory_space<smem>>
    %c0_1 = arith.constant 0 : index
    %c0_2 = arith.constant 0 : index
    %1 = vector.load %arg1[%c0_1, %c0_2] : memref<136x128xf32, #tpu.memory_space<vmem>>, vector<8x128xf32>
    %2 = vector.extract_strided_slice %1 {offsets = [0, 0], sizes = [1, 128], strides = [1, 1]} : vector<8x128xf32> to vector<1x128xf32>
    %3 = vector.extract_strided_slice %1 {offsets = [1, 0], sizes = [1, 128], strides = [1, 1]} : vector<8x128xf32> to vector<1x128xf32>
    %4 = vector.extract_strided_slice %1 {offsets = [2, 0], sizes = [1, 128], strides = [1, 1]} : vector<8x128xf32> to vector<1x128xf32>
    %5 = vector.extract_strided_slice %1 {offsets = [3, 0], sizes = [1, 128], strides = [1, 1]} : vector<8x128xf32> to vector<1x128xf32>
    %6 = vector.extract_strided_slice %1 {offsets = [4, 0], sizes = [1, 128], strides = [1, 1]} : vector<8x128xf32> to vector<1x128xf32>
    %7 = vector.extract_strided_slice %1 {offsets = [5, 0], sizes = [1, 128], strides = [1, 1]} : vector<8x128xf32> to vector<1x128xf32>
    %c8 = arith.constant 8 : index
    %c0_3 = arith.constant 0 : index
    %8 = vector.load %arg1[%c8, %c0_3] : memref<136x128xf32, #tpu.memory_space<vmem>>, vector<64x128xf32>
    %c72 = arith.constant 72 : index
    %c0_4 = arith.constant 0 : index
    %9 = vector.load %arg1[%c72, %c0_4] : memref<136x128xf32, #tpu.memory_space<vmem>>, vector<64x128xf32>
    %10 = vector.broadcast %0 : f32 to vector<1x128xf32>
    %11 = arith.mulf %10, %2 : vector<1x128xf32>
    %12 = arith.addf %11, %3 : vector<1x128xf32>
    %cst = arith.constant 0.000000e+00 : f32
    %13 = vector.broadcast %cst : f32 to vector<1x128xf32>
    %14 = arith.maximumf %12, %13 : vector<1x128xf32>
    %15 = vector.extract_strided_slice %14 {offsets = [0, 0], sizes = [1, 64], strides = [1, 1]} : vector<1x128xf32> to vector<1x64xf32>
    %cst_5 = arith.constant dense<0.000000e+00> : vector<1x128xf32>
    %16 = tpu.matmul %15, %8, %cst_5 {dimension_numbers = #tpu.dot_dimension_numbers<[1], [0], [0], [1], [0, 0, 1, 1], [], []>} : vector<1x64xf32>, vector<64x128xf32>, vector<1x128xf32> -> vector<1x128xf32>
    %17 = arith.addf %16, %4 : vector<1x128xf32>
    %cst_6 = arith.constant 0.000000e+00 : f32
    %18 = vector.broadcast %cst_6 : f32 to vector<1x128xf32>
    %19 = arith.maximumf %17, %18 : vector<1x128xf32>
    %20 = vector.extract_strided_slice %19 {offsets = [0, 0], sizes = [1, 64], strides = [1, 1]} : vector<1x128xf32> to vector<1x64xf32>
    %cst_7 = arith.constant dense<0.000000e+00> : vector<1x128xf32>
    %21 = tpu.matmul %20, %9, %cst_7 {dimension_numbers = #tpu.dot_dimension_numbers<[1], [0], [0], [1], [0, 0, 1, 1], [], []>} : vector<1x64xf32>, vector<64x128xf32>, vector<1x128xf32> -> vector<1x128xf32>
    %22 = arith.addf %21, %5 : vector<1x128xf32>
    %23 = math.tanh %22 : vector<1x128xf32>
    %24 = arith.mulf %23, %6 : vector<1x128xf32>
    %25 = arith.addf %24, %7 : vector<1x128xf32>
    %c0_8 = arith.constant 0 : index
    %c0_9 = arith.constant 0 : index
    %26 = vector.load %arg2[%c0_8, %c0_9] : memref<1x128xf32, #tpu.memory_space<vmem>>, vector<1x128xf32>
    tpu.vector_store %arg2[%c0_8, %c0_9], %25 {strides = array<i32>} : memref<1x128xf32, #tpu.memory_space<vmem>>, vector<1x128xf32>,
    return
  }
}

</mosaic_0001>

<bundles_post_ra>
// kernel: tpu_custom_call.1
= control target key start
LH: loop header
LB: loop body
LE: loop exit
PB: predicated region body
PF: predicated region fallthrough
CT: control target
= control target key end

     0   :  { %8 = vsyncpa [#allocation4], 0  ;;  %s377_s0 = inlined_call_operand.<no memory space> [shape: f32[1,1], index: 0, kind: input, shape index: {}]   ;;  %s378_s1 = inlined_call_operand.hbm [shape: f32[136,128], index: 1, kind: input, shape index: {}]   ;;  %s379_s2 = inlined_call_operand.hbm [shape: f32[1,128], index: 2, kind: output, shape index: {}]  }
   0x1   :  { %9 = vsyncpa [#allocation5], 0  ;;  %s337_s9 = smov [#allocation3]  }
   0x2   :  { %s17_s10 = sshll.u32 %s337_s9, 4  ;;  %s18_s10 = int_to_ptr.vmem [resolvable:$true] %s17_s10 }
   0x3   :  { %s301_s11 = scalar_lea.vmem %s18_s10, 2176  ;;  %p306_p1 = scmp.lt.s32.totalorder %s18_s10, %s18_s10 }
   0x4   :  { %p302_p0 = scmp.ne.s32.totalorder %s18_s10, %s301_s11  ;;  %p307_p2 = scmp.lt.s32.totalorder %s301_s11, %s301_s11 }
   0x6   :  { %p308_p3 = por %p307_p2, %p306_p1 }
   0x8   :  { %p309_p4 = pnand %p308_p3, %p302_p0 }
   0xa   :  { %312 = shalt.err (!%p309_p4)
}
   0xb   :  { %s338_s12 = smov 128   ;;  %s339_s13 = smov 8  }
   0xc   :  { %23 = dma.hbm_to_vmem [thread:$0]  %s378_s1, 2176, %s18_s10, [#allocation4], %s338_s12, %s338_s12, %s339_s13  }
   0xd   :  { %333 = dma.done.wait [#allocation4], 2176  }
   0xe   :  { %334 = vsyncadd [#allocation4], 4294965120  ;;  %v340_v0 = vmov 0.0   ;;  %vm341_vm0 = vmmov 0   ;;  %v36_v1 = vld [vmem:[#allocation3 + $0x40] sm:$0xff]  ;;  %v35_v2 = vld [vmem:[#allocation3 + $0x38] sm:$0xff]  ;;  %v45_v3 = vstv %s377_s0 }
   0xf   :  { %247 = vmatprep.subr.mxu0 %v340_v0  ;;  %263 = vmatprep.mubr.msk.f32.mxu0 %vm341_vm0, %v340_v0  ;;  %v34_v4 = vld [vmem:[#allocation3 + $0x30] sm:$0xff]  ;;  %v364_v5 = vld [vmem:[#allocation3] sm:$0xff]  ;;  %v43_v7 = vld [vmem:[#allocation3 + $0x78] sm:$0xff]  ;;  %vm54_vm1 = vcmask 523264   ;;  %s342_s0 = smov [#allocation6]  }
  0x10   :  { %266 = vmatprep.subr.mxu1 %v340_v0  ;;  %282 = vmatprep.mubr.msk.f32.mxu1 %vm341_vm0, %v340_v0  ;;  %v44_v6 = vld [vmem:[#allocation3 + $0x80] sm:$0xff]  ;;  %v33_v8 = vld [vmem:[#allocation3 + $0x28] sm:$0xff]  ;;  %v46_v9 = vmul.f32 %v45_v3, %v364_v5  ;;  %v48_v10 = vrot.slane %v364_v5, 1  ;;  %v42_v11 = vld [vmem:[#allocation3 + $0x70] sm:$0xff]  ;;  %v52_v23 = vrot.slane %v364_v5, 2  ;;  %v129_v28 = vrot.slane %v364_v5, 3 }
  0x11   :  { %248 = vmatpush3.msra.mxu0 %v36_v1  ;;  %267 = vmatpush3.msra.mxu1 %v44_v6  ;;  %v32_v12 = vld [vmem:[#allocation3 + $0x20] sm:$0xff]  ;;  %v41_v13 = vld [vmem:[#allocation3 + $0x68] sm:$0xff]  ;;  %v31_v14 = vld [vmem:[#allocation3 + $0x18] sm:$0xff]  ;;  %v205_v32 = vrot.slane %v364_v5, 4  ;;  %v208_v33 = vrot.slane %v364_v5, 5  ;;  %s218_s1 = sshll.u32 %s342_s0, 4  ;;  %s219_s1 = int_to_ptr.vmem [resolvable:$true] %s218_s1 }
  0x12   :  { %249 = vmatprep.subr.mxu0 %v340_v0  ;;  %268 = vmatprep.subr.mxu1 %v340_v0  ;;  %v50_v15 = vadd.f32 %v48_v10, %v46_v9  ;;  %v40_v16 = vld [vmem:[#allocation3 + $0x60] sm:$0xff]  ;;  %v30_v17 = vld [vmem:[#allocation3 + $0x10] sm:$0xff]  ;;  %v29_v18 = vld [vmem:[#allocation3 + $0x8] sm:$0xff]  ;;  %s313_s18 = scalar_lea.vmem %s219_s1, 16  ;;  %s317_s19 = scalar_lea.vmem %s219_s1, 32 }
  0x13   :  { %250 = vmatpush3.msra.mxu0 %v35_v2  ;;  %269 = vmatpush3.msra.mxu1 %v43_v7  ;;  %v39_v20 = vld [vmem:[#allocation3 + $0x58] sm:$0xff]  ;;  %v38_v21 = vld [vmem:[#allocation3 + $0x50] sm:$0xff]  ;;  %v37_v22 = vld [vmem:[#allocation3 + $0x48] sm:$0xff]  ;;  %p314_p5 = scmp.ne.s32.totalorder %s219_s1, %s313_s18  ;;  %p318_p6 = scmp.lt.s32.totalorder %s219_s1, %s219_s1 }
  0x14   :  { %251 = vmatprep.subr.mxu0 %v340_v0  ;;  %270 = vmatprep.subr.mxu1 %v340_v0  ;;  %v51_v19 = vmax.f32 %v50_v15, 0.0  ;;  %p319_p7 = scmp.lt.s32.totalorder %s317_s19, %s313_s18 }
  0x15   :  { %252 = vmatpush3.msra.mxu0 %v34_v4  ;;  %271 = vmatpush3.msra.mxu1 %v42_v11 }
  0x16   :  { %253 = vmatprep.subr.mxu0 %v340_v0  ;;  %272 = vmatprep.subr.mxu1 %v340_v0  ;;  %p320_p8 = por %p319_p7, %p318_p6 }
  0x17   :  { %254 = vmatpush3.msra.mxu0 %v33_v8  ;;  %273 = vmatpush3.msra.mxu1 %v41_v13 }
  0x18   :  { %255 = vmatprep.subr.mxu0 %v340_v0  ;;  %274 = vmatprep.subr.mxu1 %v340_v0  ;;  %p321_p9 = pnand %p320_p8, %p314_p5 }
  0x19   :  { %256 = vmatpush3.msra.mxu0 %v32_v12  ;;  %275 = vmatpush3.msra.mxu1 %v40_v16 }
  0x1a   :  { %257 = vmatprep.subr.mxu0 %v340_v0  ;;  %276 = vmatprep.subr.mxu1 %v340_v0 }
  0x1b   :  { %258 = vmatpush3.msra.mxu0 %v31_v14  ;;  %277 = vmatpush3.msra.mxu1 %v39_v20 }
  0x1c   :  { %259 = vmatprep.subr.mxu0 %v340_v0  ;;  %278 = vmatprep.subr.mxu1 %v340_v0 }
  0x1d   :  { %260 = vmatpush3.msra.mxu0 %v30_v17  ;;  %279 = vmatpush3.msra.mxu1 %v38_v21 }
  0x1e   :  { %261 = vmatprep.subr.mxu0 %v340_v0  ;;  %280 = vmatprep.subr.mxu1 %v340_v0 }
  0x1f   :  { %262 = vmatpush3.msra.mxu0 %v29_v18  ;;  %281 = vmatpush3.msra.mxu1 %v37_v22 }
  0x20   :  { %264 = vmatmul.mubr.msk.f32.vlgmr.msra.gmra.mxu0 %vm54_vm1, %v51_v19 }
  0xe0   :  { %v124_v24 = vpop.f32.mrf.mxu0 }
  0xe1   :  { %v125_v25 = vadd.f32 %v124_v24, %v52_v23 }
  0xe2   :  { %v265_v26 = vpop.f32.mrf.mxu0 }
  0xe3   :  { %v128_v27 = vmax.f32 %v125_v25, 0.0 }
  0xe5   :  { %283 = vmatmul.mubr.msk.f32.vlgmr.msra.gmra.mxu1 %vm54_vm1, %v128_v27 }
 0x1a5   :  { %v200_v29 = vpop.f32.mrf.mxu1 }
 0x1a6   :  { %v201_v30 = vadd.f32 %v200_v29, %v129_v28 }
 0x1a7   :  { %v284_v31 = vpop.f32.mrf.mxu1 }
 0x1a8   :  { %291 = vtanh.f32 %v201_v30 }
 0x1b5   :  { %v292_v34 = vpop.eup %291 }
 0x1b6   :  { %v207_v35 = vmul.f32 %v292_v34, %v205_v32 }
 0x1b8   :  { %v210_v36 = vadd.f32 %v208_v33, %v207_v35 }
 0x1ba   :  { %211 = vst [vmem:[#allocation6] sm:$0x1] %v210_v36 }
 0x1bb   :  { %324 = shalt.err (!%p321_p9)
}
 0x1bc   :  { %221 = dma.vmem_to_hbm [thread:$0]  %s219_s1, 16, %s379_s2, [#allocation5]  }
 0x1bd   :  { %335 = dma.done.wait [#allocation5], 16  }
 0x1be   :  { %336 = vsyncadd [#allocation5], 4294967280 }
 0x1bf   :  { %225 = vsyncpa [#allocation4], 1 }
 0x1c0   :  { %226 = vsyncpa [#allocation5], 1 }

</bundles_post_ra>
